<compile_context>
chip_gen: v6e
topology: v6e:2x2x1
jax: 0.10.0
libtpu: 0.0.40
codegen_flags: <defaults>
</compile_context>

<pallas_src>
import functools

import jax
import jax.numpy as jnp
from jax.experimental import pallas as pl
from jax.experimental.pallas import tpu as pltpu


def qnet_kernel(x_ref, w1_ref, b1_ref, w2_ref, b2_ref, w3_ref, b3_ref, out_ref):
    # x_ref:  (Bt, Dp)  bf16          w1_ref: (Dp, A*128) bf16    b1_ref: (1, A*128) f32
    # w2_ref: (A, 128, 64) bf16       b2_ref: (A, 1, 64) f32
    # w3_ref: (A, 1, 64) f32          b3_ref: (A, 1) f32
    # out_ref: (Bt, A) f32
    bt = x_ref.shape[0]
    a = out_ref.shape[1]

    # Layer 1: all agents fused into one wide MXU matmul (bf16 in, f32 accumulate).
    h1 = jnp.dot(x_ref[...], w1_ref[...], preferred_element_type=jnp.float32)
    h1 = jnp.maximum(h1 + b1_ref[...], 0.0)                      # (Bt, A*128) f32

    # Layer 2: per-agent batched matmul (A is the batch dim) -- no block-diag zeros.
    # Lane-aligned reshape (A*128 -> A x 128); small transpose lands on the XLU.
    h1a = jnp.transpose(h1.reshape(bt, a, 128), (1, 0, 2)).astype(jnp.bfloat16)  # (A, Bt, 128)
    h2 = jnp.einsum("abh,aho->abo", h1a, w2_ref[...],
                    preferred_element_type=jnp.float32)
    h2 = jnp.maximum(h2 + b2_ref[...], 0.0)                      # (A, Bt, 64) f32

    # Layer 3 (64 -> 1 per agent) on VPU + XLU lane-reduce; keeps the MXU/store path
    # free of narrow-N work.  One dense (Bt, A) store.
    q = jnp.sum(h2 * w3_ref[...], axis=-1) + b3_ref[...]         # (A, Bt) f32
    out_ref[...] = jnp.transpose(q, (1, 0)).astype(out_ref.dtype)


def pack_params(params):
    """Pack stacked per-agent weights ONCE per parameter version (hoisted out of forward)."""
    w1, b1, w2, b2, w3, b3 = params
    num_agents, in_dim, _ = w1.shape
    dp = ((in_dim + 7) // 8) * 8  # pad K to a sublane multiple (45 -> 48), exact (zero rows)
    # Layer 1: (A, D, 128) -> wide (Dp, A*128); column order = a*128 + h.
    w1w = jnp.transpose(w1, (1, 0, 2)).reshape(in_dim, num_agents * 128)
    w1w = jnp.pad(w1w, ((0, dp - in_dim), (0, 0))).astype(jnp.bfloat16)
    b1w = b1.reshape(1, num_agents * 128).astype(jnp.float32)
    # Layer 2: naturally stacked, bf16 MXU operand.
    w2s = w2.astype(jnp.bfloat16)                                 # (A, 128, 64)
    b2s = b2.reshape(num_agents, 1, 64).astype(jnp.float32)
    # Layer 3: VPU path, keep f32.
    w3s = w3.reshape(num_agents, 1, 64).astype(jnp.float32)
    b3s = b3.reshape(num_agents, 1).astype(jnp.float32)
    return w1w, b1w, w2s, b2s, w3s, b3s


@functools.partial(jax.jit, static_argnames=("block_b",))
def qnet_forward(obs, action, packed, *, block_b=256):
    """obs: (B, A, obs_dim) f32; action: (B, A, act_dim) f32 -> (B, A) f32."""
    w1w, b1w, w2s, b2s, w3s, b3s = packed
    b = obs.shape[0]
    a = b3s.shape[0]
    dp = w1w.shape[0]

    x = jnp.concatenate(
        [obs.reshape(b, -1), action.reshape(b, -1)], axis=1
    ).astype(jnp.float32)
    d = x.shape[1]

    # Batch tiling: keep per-step VMEM bounded; small B degenerates to one step.
    bt = min(block_b, max(8, ((b + 7) // 8) * 8))
    bp = ((b + bt - 1) // bt) * bt
    nb = bp // bt

    # Zero-pad K and B; cast activations to bf16 once (MXU operand, f32 accumulate).
    x = jnp.pad(x, ((0, bp - b), (0, dp - d))).astype(jnp.bfloat16)

    out = pl.pallas_call(
        qnet_kernel,
        out_shape=jax.ShapeDtypeStruct((bp, a), jnp.float32),
        grid_spec=pltpu.PrefetchScalarGridSpec(
            num_scalar_prefetch=0,
            grid=(nb,),
            in_specs=[
                pl.BlockSpec((bt, dp), lambda i: (i, 0)),          # x: tiled over B
                pl.BlockSpec((dp, a * 128), lambda i: (0, 0)),     # W1 wide (VMEM-resident)
                pl.BlockSpec((1, a * 128), lambda i: (0, 0)),      # b1
                pl.BlockSpec((a, 128, 64), lambda i: (0, 0, 0)),   # W2 stacked per-agent
                pl.BlockSpec((a, 1, 64), lambda i: (0, 0, 0)),     # b2
                pl.BlockSpec((a, 1, 64), lambda i: (0, 0, 0)),     # w3
                pl.BlockSpec((a, 1), lambda i: (0, 0)),            # b3
            ],
            out_specs=pl.BlockSpec((bt, a), lambda i: (i, 0)),     # dense (Bt, A) store
        ),
        compiler_params=pltpu.CompilerParams(
            dimension_semantics=("parallel",),  # independent B tiles -> both TCs on v7x
        ),
    )(x, w1w, b1w, w2s, b2s, w3s, b3s)
    return out[:b]


def init_params(key, num_agents, in_dim):
    """Deterministic synthetic parameters. Stored as (in, out) so forward does x @ W."""
    ks = jax.random.split(key, 6)
    scale = 0.1
    w1 = scale * jax.random.normal(ks[0], (num_agents, in_dim, 128), jnp.float32)
    b1 = scale * jax.random.normal(ks[1], (num_agents, 128), jnp.float32)
    w2 = scale * jax.random.normal(ks[2], (num_agents, 128, 64), jnp.float32)
    b2 = scale * jax.random.normal(ks[3], (num_agents, 64), jnp.float32)
    w3 = scale * jax.random.normal(ks[4], (num_agents, 64), jnp.float32)
    b3 = scale * jax.random.normal(ks[5], (num_agents, 1), jnp.float32)
    return (w1, b1, w2, b2, w3, b3)


def qnet_reference(obs, action, params):
    """Plain-JAX f32 reference mirroring the PyTorch forward, for a sanity check."""
    b = obs.shape[0]
    x = jnp.concatenate([obs.reshape(b, -1), action.reshape(b, -1)], axis=1)
    w1, b1, w2, b2, w3, b3 = params
    cols = []
    for a in range(w1.shape[0]):
        h1 = jax.nn.relu(x @ w1[a] + b1[a])
        h2 = jax.nn.relu(h1 @ w2[a] + b2[a])
        q = h2 @ w3[a][:, None] + b3[a]
        cols.append(q)
    return jnp.concatenate(cols, axis=1)


if __name__ == "__main__":
    # Small shapes consistent with the module: 3 agents, obs_dim=10, one-hot
    # action of size 5 per agent, batch of 8.
    B, A, OBS_DIM, ACT_DIM = 8, 3, 10, 5
    D = A * OBS_DIM + A * ACT_DIM  # total_obs + total_action = 45

    key = jax.random.PRNGKey(0)
    k_obs, k_act, k_par = jax.random.split(key, 3)
    obs = jax.random.normal(k_obs, (B, A, OBS_DIM), jnp.float32)
    # one-hot actions (what MADDPG feeds the centralized critic)
    act_idx = jax.random.randint(k_act, (B, A), 0, ACT_DIM)
    action = jax.nn.one_hot(act_idx, ACT_DIM, dtype=jnp.float32)

    params = init_params(k_par, A, D)
    packed = pack_params(params)          # pack ONCE; reuse across forward calls

    out = qnet_forward(obs, action, packed)
    out = jax.block_until_ready(out)

    ref = qnet_reference(obs, action, params)
    assert out.shape == (B, A), out.shape
    # bf16 matmul operands (f32 accumulation) -> loosened tolerance vs pure-f32 reference.
    assert jnp.allclose(out, ref, atol=5e-2, rtol=5e-2), "mismatch vs reference"

    print("KERNEL_OK")
</pallas_src>

<mosaic_0001>
module attributes {stable_mosaic.version = 11 : i64} {
  func.func @qnet_kernel(%arg0: i32, %arg1: memref<8x48xbf16, #tpu.memory_space<vmem>>, %arg2: memref<48x384xbf16, #tpu.memory_space<vmem>>, %arg3: memref<1x384xf32, #tpu.memory_space<vmem>>, %arg4: memref<3x128x64xbf16, #tpu.memory_space<vmem>>, %arg5: memref<3x1x64xf32, #tpu.memory_space<vmem>>, %arg6: memref<3x1x64xf32, #tpu.memory_space<vmem>>, %arg7: memref<3x1xf32, #tpu.memory_space<vmem>>, %arg8: memref<8x3xf32, #tpu.memory_space<vmem>>) attributes {dimension_semantics = [#tpu.dimension_semantics<parallel>], iteration_bounds = array<i64: 1>, scalar_prefetch = 0 : i64, scratch_operands = 0 : i64, tpu.core_type = #tpu.core_type<tc>, window_params = [{transform_indices = @transform_0, window_bounds = array<i64: 8, 48>}, {pipeline_mode = #tpu.pipeline_mode<synchronous>, transform_indices = @transform_1, window_bounds = array<i64: 48, 384>}, {pipeline_mode = #tpu.pipeline_mode<synchronous>, transform_indices = @transform_2, window_bounds = array<i64: 1, 384>}, {pipeline_mode = #tpu.pipeline_mode<synchronous>, transform_indices = @transform_3, window_bounds = array<i64: 3, 128, 64>}, {pipeline_mode = #tpu.pipeline_mode<synchronous>, transform_indices = @transform_4, window_bounds = array<i64: 3, 1, 64>}, {pipeline_mode = #tpu.pipeline_mode<synchronous>, transform_indices = @transform_5, window_bounds = array<i64: 3, 1, 64>}, {pipeline_mode = #tpu.pipeline_mode<synchronous>, transform_indices = @transform_6, window_bounds = array<i64: 3, 1>}, {transform_indices = @transform_7, window_bounds = array<i64: 8, 3>}]} {
    %c0 = arith.constant 0 : index
    %c0_0 = arith.constant 0 : index
    %0 = vector.load %arg1[%c0, %c0_0] : memref<8x48xbf16, #tpu.memory_space<vmem>>, vector<8x48xbf16>
    %c0_1 = arith.constant 0 : index
    %c0_2 = arith.constant 0 : index
    %1 = vector.load %arg2[%c0_1, %c0_2] : memref<48x384xbf16, #tpu.memory_space<vmem>>, vector<48x384xbf16>
    %cst = arith.constant dense<0.000000e+00> : vector<8x384xf32>
    %2 = tpu.matmul %0, %1, %cst {dimension_numbers = #tpu.dot_dimension_numbers<[1], [0], [0], [1], [0, 0, 1, 1], [], []>} : vector<8x48xbf16>, vector<48x384xbf16>, vector<8x384xf32> -> vector<8x384xf32>
    %c0_3 = arith.constant 0 : index
    %c0_4 = arith.constant 0 : index
    %3 = vector.load %arg3[%c0_3, %c0_4] : memref<1x384xf32, #tpu.memory_space<vmem>>, vector<1x384xf32>
    %4 = vector.broadcast %3 : vector<1x384xf32> to vector<8x384xf32>
    %5 = arith.addf %2, %4 : vector<8x384xf32>
    %cst_5 = arith.constant 0.000000e+00 : f32
    %6 = vector.broadcast %cst_5 : f32 to vector<8x384xf32>
    %7 = arith.maximumf %5, %6 : vector<8x384xf32>
    %8 = vector.shape_cast %7 : vector<8x384xf32> to vector<8x3x128xf32>
    %9 = tpu.transpose %8, [1, 0, 2] : vector<8x3x128xf32> -> vector<3x8x128xf32>
    %10 = arith.truncf %9 : vector<3x8x128xf32> to vector<3x8x128xbf16>
    %c0_6 = arith.constant 0 : index
    %c0_7 = arith.constant 0 : index
    %c0_8 = arith.constant 0 : index
    %11 = vector.load %arg4[%c0_6, %c0_7, %c0_8] : memref<3x128x64xbf16, #tpu.memory_space<vmem>>, vector<3x128x64xbf16>
    "tpu.trace_start"() <{level = 10 : i32, message = "abh,aho->abo"}> : () -> ()
    %cst_9 = arith.constant dense<0.000000e+00> : vector<3x8x64xf32>
    %12 = tpu.matmul %10, %11, %cst_9 {dimension_numbers = #tpu.dot_dimension_numbers<[2], [1], [1], [2], [0, 0, 0, 1, 1, 2], [0], [0]>} : vector<3x8x128xbf16>, vector<3x128x64xbf16>, vector<3x8x64xf32> -> vector<3x8x64xf32>
    "tpu.trace_stop"() : () -> ()
    %c0_10 = arith.constant 0 : index
    %c0_11 = arith.constant 0 : index
    %c0_12 = arith.constant 0 : index
    %13 = vector.load %arg5[%c0_10, %c0_11, %c0_12] : memref<3x1x64xf32, #tpu.memory_space<vmem>>, vector<3x1x64xf32>
    %14 = vector.broadcast %13 : vector<3x1x64xf32> to vector<3x8x64xf32>
    %15 = arith.addf %12, %14 : vector<3x8x64xf32>
    %cst_13 = arith.constant 0.000000e+00 : f32
    %16 = vector.broadcast %cst_13 : f32 to vector<3x8x64xf32>
    %17 = arith.maximumf %15, %16 : vector<3x8x64xf32>
    %c0_14 = arith.constant 0 : index
    %c0_15 = arith.constant 0 : index
    %c0_16 = arith.constant 0 : index
    %18 = vector.load %arg6[%c0_14, %c0_15, %c0_16] : memref<3x1x64xf32, #tpu.memory_space<vmem>>, vector<3x1x64xf32>
    %19 = vector.broadcast %18 : vector<3x1x64xf32> to vector<3x8x64xf32>
    %20 = arith.mulf %17, %19 : vector<3x8x64xf32>
    %cst_17 = arith.constant dense<0.000000e+00> : vector<3x8xf32>
    %21 = vector.multi_reduction <add>, %20, %cst_17 [2] : vector<3x8x64xf32> to vector<3x8xf32>
    %c0_18 = arith.constant 0 : index
    %c0_19 = arith.constant 0 : index
    %22 = vector.load %arg7[%c0_18, %c0_19] : memref<3x1xf32, #tpu.memory_space<vmem>>, vector<3x1xf32>
    %23 = vector.broadcast %22 : vector<3x1xf32> to vector<3x8xf32>
    %24 = arith.addf %21, %23 : vector<3x8xf32>
    %25 = tpu.transpose %24, [1, 0] : vector<3x8xf32> -> vector<8x3xf32>
    %c0_20 = arith.constant 0 : index
    %c0_21 = arith.constant 0 : index
    %26 = vector.load %arg8[%c0_20, %c0_21] : memref<8x3xf32, #tpu.memory_space<vmem>>, vector<8x3xf32>
    tpu.vector_store %arg8[%c0_20, %c0_21], %25 {strides = array<i32>} : memref<8x3xf32, #tpu.memory_space<vmem>>, vector<8x3xf32>,
    return
  }
  func.func @transform_0(%arg0: i32) -> (i32, i32) {
    %c0_i32 = arith.constant 0 : i32
    %c0_i32_0 = arith.constant 0 : i32
    return %arg0, %c0_i32 : i32, i32
  }
  func.func @transform_1(%arg0: i32) -> (i32, i32) {
    %c0_i32 = arith.constant 0 : i32
    %c0_i32_0 = arith.constant 0 : i32
    %c0_i32_1 = arith.constant 0 : i32
    return %c0_i32, %c0_i32_0 : i32, i32
  }
  func.func @transform_2(%arg0: i32) -> (i32, i32) {
    %c0_i32 = arith.constant 0 : i32
    %c0_i32_0 = arith.constant 0 : i32
    %c0_i32_1 = arith.constant 0 : i32
    return %c0_i32, %c0_i32_0 : i32, i32
  }
  func.func @transform_3(%arg0: i32) -> (i32, i32, i32) {
    %c0_i32 = arith.constant 0 : i32
    %c0_i32_0 = arith.constant 0 : i32
    %c0_i32_1 = arith.constant 0 : i32
    %c0_i32_2 = arith.constant 0 : i32
    return %c0_i32, %c0_i32_0, %c0_i32_1 : i32, i32, i32
  }
  func.func @transform_4(%arg0: i32) -> (i32, i32, i32) {
    %c0_i32 = arith.constant 0 : i32
    %c0_i32_0 = arith.constant 0 : i32
    %c0_i32_1 = arith.constant 0 : i32
    %c0_i32_2 = arith.constant 0 : i32
    return %c0_i32, %c0_i32_0, %c0_i32_1 : i32, i32, i32
  }
  func.func @transform_5(%arg0: i32) -> (i32, i32, i32) {
    %c0_i32 = arith.constant 0 : i32
    %c0_i32_0 = arith.constant 0 : i32
    %c0_i32_1 = arith.constant 0 : i32
    %c0_i32_2 = arith.constant 0 : i32
    return %c0_i32, %c0_i32_0, %c0_i32_1 : i32, i32, i32
  }
  func.func @transform_6(%arg0: i32) -> (i32, i32) {
    %c0_i32 = arith.constant 0 : i32
    %c0_i32_0 = arith.constant 0 : i32
    %c0_i32_1 = arith.constant 0 : i32
    return %c0_i32, %c0_i32_0 : i32, i32
  }
  func.func @transform_7(%arg0: i32) -> (i32, i32) {
    %c0_i32 = arith.constant 0 : i32
    %c0_i32_0 = arith.constant 0 : i32
    return %arg0, %c0_i32 : i32, i32
  }
}

</mosaic_0001>

<bundles_post_ra>
// kernel: qnet_forward.1
= control target key start
LH: loop header
LB: loop body
LE: loop exit
PB: predicated region body
PF: predicated region fallthrough
CT: control target
= control target key end

     0   :  { %v979_v1 = vmov 0   ;;  %v980_v2 = vmov 0.0   ;;  %vm981_vm0 = vmmov 0   ;;  %vm105_vm1 = vcmask 392192   ;;  %s1214_s1 = inlined_call_operand.vmem [shape: bf16[48,384], index: 1, kind: input, shape index: {}]   ;;  %s1215_s0 = inlined_call_operand.vmem [shape: bf16[8,48], index: 0, kind: input, shape index: {}]   ;;  %s1216_s3 = inlined_call_operand.vmem [shape: bf16[3,128,64], index: 3, kind: input, shape index: {}]   ;;  %s1217_s2 = inlined_call_operand.vmem [shape: f32[1,384], index: 2, kind: input, shape index: {}]   ;;  %s1218_s4 = inlined_call_operand.vmem [shape: f32[3,1,64], index: 4, kind: input, shape index: {}]   ;;  %s1219_s5 = inlined_call_operand.vmem [shape: f32[3,1,64], index: 5, kind: input, shape index: {}]   ;;  %s1220_s6 = inlined_call_operand.vmem [shape: f32[3,1], index: 6, kind: input, shape index: {}]   ;;  %s1221_s7 = inlined_call_operand.vmem [shape: f32[8,3], index: 7, kind: output, shape index: {}]  }
   0x1   :  { %v943_v0 = vld [vmem:[%s1214_s1 + $0x34] ss:$12 sps:$4 sm:$0xff]   ;;  %141 = vmatprep.mubr.bf16.mxu1 %v979_v1  ;;  %876 = vmatprep.subr.bf16.mxu0 %v980_v2  ;;  %v945_v3 = vld [vmem:[%s1214_s1 + $0x30] ss:$12 sps:$4 sm:$0xff]   ;;  %v948_v5 = vld [vmem:[%s1214_s1 + $0x18] ss:$12 sps:$4 sm:$0xff]   ;;  %v42_v28 = vlaneseq }
   0x2   :  { %892 = vmatprep.mubr.msk.bf16.mxu0 %vm981_vm0, %v980_v2  ;;  %941 = vset.pattern.permute.xlu1 %v979_v1  ;;  %v946_v4 = vld [vmem:[%s1214_s1 + $0x1c] ss:$12 sps:$4 sm:$0xff]   ;;  %v949_v6 = vld [vmem:[%s1214_s1 + $0x4] ss:$12 sps:$4 sm:$0xff]   ;;  %v951_v7 = vld [vmem:[%s1214_s1] ss:$12 sps:$4 sm:$0xff]  }
   0x3   :  { %119 = vmatprep.subr.bf16.mxu1 %v943_v0  ;;  %942 = vset.pattern.permute.xlu0 %v979_v1  ;;  %v27_v8 = vld [vmem:[%s1215_s0] sm:$0xf]  ;;  %v952_v9 = vld [vmem:[%s1214_s1 + $0x38] ss:$12 sps:$4 sm:$0xff]   ;;  %v954_v11 = vld [vmem:[%s1214_s1 + $0x8] ss:$12 sps:$4 sm:$0xff]  }
   0x4   :  { %120 = vmatpush1.bf16.msra.mxu1 %v945_v3  ;;  %v953_v10 = vld [vmem:[%s1214_s1 + $0x20] ss:$12 sps:$4 sm:$0xff]   ;;  %v955_v12 = vld [vmem:[%s1216_s3 + $0x38] sm:$0xff]   ;;  %v957_v14 = vld [vmem:[%s1216_s3 + $0x30] sm:$0xff]   ;;  %v1129_v29 = vshrl.u32 %v42_v28, 7  ;;  %vm690_vm2 = vcmask 523264  }
   0x5   :  { %121 = vmatprep.subr.bf16.mxu1 %v946_v4  ;;  %v956_v13 = vld [vmem:[%s1216_s3 + $0x78] sm:$0xff]   ;;  %877 = vmatpush3.bf16.msra.mxu0 %v955_v12  ;;  %v958_v15 = vld [vmem:[%s1216_s3 + $0x70] sm:$0xff]   ;;  %v959_v16 = vld [vmem:[%s1216_s3 + $0x28] sm:$0xff]   ;;  %v982_v41 = vmov 1983009808   ;;  %vm749_vm3 = vcmask 1041409  }
   0x6   :  { %878 = vmatprep.subr.bf16.mxu0 %v980_v2  ;;  %v960_v17 = vld [vmem:[%s1216_s3 + $0x68] sm:$0xff]   ;;  %v961_v18 = vld [vmem:[%s1216_s3 + $0x20] sm:$0xff]   ;;  %v963_v20 = vld [vmem:[%s1216_s3 + $0x18] sm:$0xff]   ;;  %v48_v30 = vsub.s32 1, %v1129_v29  ;;  %v44_v34 = vsub.s32 0, %v1129_v29  ;;  %v52_v37 = vsub.s32 2, %v1129_v29  ;;  %v196_v42 = vunpack.c.l.s4 %v982_v41 }
   0x7   :  { %v962_v19 = vld [vmem:[%s1216_s3 + $0x60] sm:$0xff]   ;;  %v964_v21 = vld [vmem:[%s1216_s3 + $0x58] sm:$0xff]   ;;  %v965_v22 = vld [vmem:[%s1216_s3 + $0x10] sm:$0xff]   ;;  %v983_v44 = vmov 1934713408   ;;  %vm751_vm4 = vcmask 1042434  }
   0x8   :  { %122 = vmatpush1.bf16.msra.mxu1 %v948_v5  ;;  %v966_v23 = vld [vmem:[%s1216_s3 + $0x50] sm:$0xff]   ;;  %v967_v24 = vld [vmem:[%s1216_s3 + $0x8] sm:$0xff]   ;;  %v969_v26 = vld [vmem:[%s1216_s3] sm:$0xff]   ;;  %v227_v45 = vunpack.c.l.s4 %v983_v44  ;;  %v197_v48 = vunpack.c.0.s8 %v196_v42  ;;  %vm786_vm5 = vcmask 23552  }
   0x9   :  { %123 = vmatprep.subr.bf16.mxu1 %v949_v6  ;;  %879 = vmatpush3.bf16.msra.mxu0 %v957_v14  ;;  %v968_v25 = vld [vmem:[%s1216_s3 + $0x48] sm:$0xff]   ;;  %v970_v27 = vld [vmem:[%s1216_s3 + $0x40] sm:$0xff]  }
   0xa   :  { %880 = vmatprep.subr.bf16.mxu0 %v980_v2  ;;  %v40_v31 = vld [vmem:[%s1217_s2] sm:$0x7]  ;;  %v228_v51 = vunpack.c.0.s8 %v227_v45  ;;  %v200_v54 = vsub.s32 %v197_v48, %v1129_v29 }
   0xb   :  { %v49_v35 = vrot.slane %v40_v31, %v48_v30  ;;  %v45_v39 = vrot.slane %v40_v31, %v44_v34  ;;  %v53_v43 = vrot.slane %v40_v31, %v52_v37  ;;  %v972_v31 = vld [vmem:[%s1216_s3 + $0xb0] sm:$0xff]  }
   0xc   :  { %124 = vmatpush1.bf16.msra.mxu1 %v951_v7  ;;  %v231_v60 = vsub.s32 %v228_v51, %v1129_v29 }
   0xd   :  { %866 = vmatprep.subr.bf16.mxu1 %v980_v2  ;;  %881 = vmatpush3.bf16.msra.mxu0 %v959_v16 }
   0xe   :  { %882 = vmatprep.subr.bf16.mxu0 %v980_v2 }
   0xf   :  { %801 = vmatmul.mubr.msk.bf16.vlgmr.msra.gmra.mxu1 %vm105_vm1, %v27_v8 }
  0x10   :  { %867 = vmatpush3.bf16.msra.mxu1 %v952_v9  ;;  %872 = vmatprep.mubr.msk.bf16.mxu1 %vm981_vm0, %v980_v2 }
  0x11   :  { %868 = vmatprep.subr.bf16.mxu1 %v980_v2  ;;  %883 = vmatpush3.bf16.msra.mxu0 %v961_v18 }
  0x12   :  { %884 = vmatprep.subr.bf16.mxu0 %v980_v2 }
  0x14   :  { %869 = vmatpush3.bf16.msra.mxu1 %v953_v10 }
  0x15   :  { %870 = vmatprep.subr.bf16.mxu1 %v980_v2  ;;  %885 = vmatpush3.bf16.msra.mxu0 %v963_v20 }
  0x16   :  { %886 = vmatprep.subr.bf16.mxu0 %v980_v2 }
  0x18   :  { %871 = vmatpush3.bf16.msra.mxu1 %v954_v11 }
  0x19   :  { %896 = vmatprep.subr.bf16.mxu1 %v980_v2  ;;  %887 = vmatpush3.bf16.msra.mxu0 %v965_v22 }
  0x1a   :  { %888 = vmatprep.subr.bf16.mxu0 %v980_v2 }
  0x1b   :  { %873 = vmatmul.mubr.msk.bf16.vlgmr.msra.gmra.mxu1 %vm105_vm1, %v27_v8 }
  0x1c   :  { %912 = vmatprep.mubr.msk.bf16.mxu1 %vm981_vm0, %v980_v2  ;;  %897 = vmatpush3.bf16.msra.mxu1 %v956_v13 }
  0x1d   :  { %898 = vmatprep.subr.bf16.mxu1 %v980_v2  ;;  %889 = vmatpush3.bf16.msra.mxu0 %v967_v24 }
  0x1e   :  { %890 = vmatprep.subr.bf16.mxu0 %v980_v2 }
  0x20   :  { %899 = vmatpush3.bf16.msra.mxu1 %v958_v15 }
  0x21   :  { %900 = vmatprep.subr.bf16.mxu1 %v980_v2  ;;  %891 = vmatpush3.bf16.msra.mxu0 %v969_v26 }
  0x22   :  { %916 = vmatprep.subr.bf16.mxu0 %v980_v2 }
  0x24   :  { %901 = vmatpush3.bf16.msra.mxu1 %v960_v17 }
  0x25   :  { %902 = vmatprep.subr.bf16.mxu1 %v980_v2 }
  0x28   :  { %903 = vmatpush3.bf16.msra.mxu1 %v962_v19 }
  0x29   :  { %904 = vmatprep.subr.bf16.mxu1 %v980_v2 }
  0x2c   :  { %905 = vmatpush3.bf16.msra.mxu1 %v964_v21 }
  0x2d   :  { %906 = vmatprep.subr.bf16.mxu1 %v980_v2 }
  0x30   :  { %907 = vmatpush3.bf16.msra.mxu1 %v966_v23 }
  0x31   :  { %908 = vmatprep.subr.bf16.mxu1 %v980_v2 }
  0x34   :  { %909 = vmatpush3.bf16.msra.mxu1 %v968_v25  ;;  %v971_v25 = vld [vmem:[%s1216_s3 + $0xb8] sm:$0xff]  }
  0x35   :  { %910 = vmatprep.subr.bf16.mxu1 %v980_v2 }
  0x38   :  { %911 = vmatpush3.bf16.msra.mxu1 %v970_v27 }
  0xcf   :  { %v143_v32 = vpop.f32.mrf.mxu1 }
  0xd0   :  { %v144_v46 = vadd.f32 %v143_v32, %v45_v39  ;;  %v973_v32 = vld [vmem:[%s1216_s3 + $0xa8] sm:$0xff]  }
  0xd1   :  { %v145_v33 = vpop.f32.mrf.mxu1 }
  0xd2   :  { %v146_v40 = vadd.f32 %v145_v33, %v49_v35  ;;  %v190_v53 = vmax.f32 %v144_v46, 0.0  ;;  %v974_v33 = vld [vmem:[%s1216_s3 + $0xa0] sm:$0xff]   ;;  %v975_v35 = vld [vmem:[%s1216_s3 + $0x98] sm:$0xff]  }
  0xd3   :  { %v147_v36 = vpop.f32.mrf.mxu1  ;;  %v805_v46 = vld [vmem:[%s1218_s4] ss:$0 sm:$0xff] }
  0xd4   :  { %v191_v47 = vmax.f32 %v146_v40, 0.0  ;;  %v976_v36 = vld [vmem:[%s1216_s3 + $0x90] sm:$0xff]   ;;  %v977_v40 = vld [vmem:[%s1216_s3 + $0x88] sm:$0xff]  }
  0xd5   :  { %v148_v38 = vpop.f32.mrf.mxu1 }
  0xd6   :  { %v209_v55 = vcombine.high %v191_v47, %v980_v2  ;;  %v216_v62 = vrot.slane %v191_v47, %v200_v54  ;;  %v806_v47 = vld [vmem:[%s1218_s4 + $0x1] ss:$0 sm:$0xff] }
  0xd8   :  { %v223_v63 = vrot.slane %v209_v55, %v200_v54 }
  0xdb   :  { %v184_v49 = vpop.f32.mrf.mxu1 }
  0xdc   :  { %v185_v50 = vadd.f32 %v184_v49, %v53_v43  ;;  %v978_v43 = vld [vmem:[%s1216_s3 + $0x80] sm:$0xff]  }
  0xdd   :  { %v874_v52 = vpop.f32.mrf.mxu1 }
  0xde   :  { %v192_v56 = vmax.f32 %v185_v50, 0.0 }
  0xdf   :  { %v187_v57 = vpop.f32.mrf.mxu1 }
  0xe0   :  { %v193_v58 = vcombine.low %v190_v53, %v192_v56  ;;  %v194_v59 = vcombine.high %v190_v53, %v192_v56 }
  0xe1   :  { %v875_v61 = vpop.f32.mrf.mxu1 }
  0xe2   :  { %v201_v0 = vrot.slane %v193_v58, %v200_v54  ;;  %v208_v1 = vrot.slane %v194_v59, %v200_v54  ;;  %v833_v58 = vld [vmem:[%s1219_s5 + $0x1] ss:$0 sm:$0xff] }
  0xe4   :  { %v224_v3 = vcombine.low %v201_v0, %v216_v62  ;;  %v225_v4 = vcombine.high %v201_v0, %v216_v62  ;;  %v240_v5 = vcombine.low %v208_v1, %v223_v63  ;;  %v241_v6 = vcombine.high %v208_v1, %v223_v63  ;;  %v807_v1 = vld [vmem:[%s1218_s4 + $0x2] ss:$0 sm:$0xff] }
  0xe6   :  { %v232_v7 = vrot.slane %v224_v3, %v231_v60  ;;  %v239_v8 = vrot.slane %v225_v4, %v231_v60  ;;  %v248_v9 = vrot.slane %v240_v5, %v231_v60  ;;  %v255_v10 = vrot.slane %v241_v6, %v231_v60  ;;  %v834_v6 = vld [vmem:[%s1219_s5 + $0x2] ss:$0 sm:$0xff] }
  0xe8   :  { %v260_v11 = vcombine.low %v232_v7, %v239_v8  ;;  %v803_v12 = vcombine.high %v232_v7, %v239_v8  ;;  %v276_v13 = vcombine.low %v248_v9, %v255_v10  ;;  %v804_v14 = vcombine.high %v248_v9, %v255_v10 }
  0xea   :  { %v267_v15 = vrot.slane %v260_v11, %v200_v54  ;;  %v275_v16 = vrot.slane %v803_v12, %v200_v54  ;;  %v283_v17 = vrot.slane %v276_v13, %v200_v54  ;;  %v291_v18 = vrot.slane %v804_v14, %v200_v54  ;;  %v700_v12 = vld [vmem:[%s1220_s6] sm:$0x7] }
  0xec   :  { %v292_v19 = vcombine.low %v267_v15, %v275_v16  ;;  %v308_v20 = vcombine.low %v283_v17, %v291_v18  ;;  %v293_v38 = vcombine.high %v267_v15, %v275_v16  ;;  %v309_v39 = vcombine.high %v283_v17, %v291_v18 }
  0xee   :  { %v300_v21 = vrot.slane %v292_v19, %v231_v60  ;;  %v316_v22 = vrot.slane %v308_v20, %v231_v60  ;;  %v307_v41 = vrot.slane %v293_v38, %v231_v60  ;;  %v323_v42 = vrot.slane %v309_v39, %v231_v60 }
  0xf0   :  { %v324_v23 = vcombine.low %v300_v21, %v316_v22  ;;  %v325_v24 = vcombine.high %v300_v21, %v316_v22  ;;  %v326_v44 = vcombine.low %v307_v41, %v323_v42 }
  0xf2   :  { %v327_v26 = vpack.c.bf16 %v324_v23, %v324_v23  ;;  %v328_v27 = vpack.c.bf16 %v325_v24, %v325_v24  ;;  %v329_v45 = vpack.c.bf16 %v326_v44, %v326_v44  ;;  %v736_v23 = vand.u32 127, %v42_v28 }
  0xf4   :  { %893 = vmatmul.mubr.bf16.vlgmr.msra.gmra.mxu0 %v327_v26  ;;  %913 = vmatmul.mubr.bf16.vlgmr.msra.gmra.mxu1 %v328_v27  ;;  %v739_v24 = vsub.s32 %v736_v23, %v1129_v29 }
  0xf5   :  { %917 = vmatpush3.bf16.msra.mxu0 %v971_v25  ;;  %932 = vmatprep.mubr.msk.bf16.mxu0 %vm981_vm0, %v980_v2 }
  0xf6   :  { %918 = vmatprep.subr.bf16.mxu0 %v980_v2 }
  0xf9   :  { %919 = vmatpush3.bf16.msra.mxu0 %v972_v31 }
  0xfa   :  { %920 = vmatprep.subr.bf16.mxu0 %v980_v2 }
  0xfd   :  { %921 = vmatpush3.bf16.msra.mxu0 %v973_v32 }
  0xfe   :  { %922 = vmatprep.subr.bf16.mxu0 %v980_v2 }
 0x101   :  { %923 = vmatpush3.bf16.msra.mxu0 %v974_v33 }
 0x102   :  { %924 = vmatprep.subr.bf16.mxu0 %v980_v2 }
 0x105   :  { %925 = vmatpush3.bf16.msra.mxu0 %v975_v35 }
 0x106   :  { %926 = vmatprep.subr.bf16.mxu0 %v980_v2 }
 0x109   :  { %927 = vmatpush3.bf16.msra.mxu0 %v976_v36 }
 0x10a   :  { %928 = vmatprep.subr.bf16.mxu0 %v980_v2 }
 0x10d   :  { %929 = vmatpush3.bf16.msra.mxu0 %v977_v40 }
 0x10e   :  { %930 = vmatprep.subr.bf16.mxu0 %v980_v2  ;;  %v832_v2 = vld [vmem:[%s1219_s5] ss:$0 sm:$0xff] }
 0x111   :  { %931 = vmatpush3.bf16.msra.mxu0 %v978_v43 }
 0x114   :  { %933 = vmatmul.mubr.bf16.vlgmr.msra.gmra.mxu0 %v329_v45 }
 0x1b4   :  { %v481_v48 = vpop.f32.mrf.mxu0  ;;  %v569_v49 = vpop.f32.mrf.mxu1 }
 0x1b5   :  { %v482_v50 = vadd.f32 %v805_v46, %v481_v48  ;;  %v570_v51 = vadd.f32 %v806_v47, %v569_v49 }
 0x1b6   :  { %v894_v52 = vpop.f32.mrf.mxu0  ;;  %v914_v53 = vpop.f32.mrf.mxu1 }
 0x1b7   :  { %v663_v54 = vmax.f32 %v482_v50, 0.0  ;;  %v664_v55 = vmax.f32 %v570_v51, 0.0 }
 0x1b8   :  { %v484_v56 = vpop.f32.mrf.mxu0  ;;  %v572_v57 = vpop.f32.mrf.mxu1 }
 0x1b9   :  { %v687_v59 = vmul.f32 %v832_v2, %v663_v54  ;;  %v688_v63 = vmul.f32 %v833_v58, %v664_v55 }
 0x1ba   :  { %v895_v60 = vpop.f32.mrf.mxu0  ;;  %v915_v61 = vpop.f32.mrf.mxu1 }
 0x1bb   :  { %v691_v62 = vsel %vm690_vm2, %v687_v59, 0.0  ;;  %v694_v0 = vsel %vm690_vm2, %v688_v63, 0.0 }
 0x1bc   :  { %692 = vadd.xlane.f32.xlu0 %v691_v62 }
 0x1c0   :  { %695 = vadd.xlane.f32.xlu0 %v694_v0 }
 0x1d4   :  { %v657_v3 = vpop.f32.mrf.mxu0 }
 0x1d5   :  { %v658_v4 = vadd.f32 %v807_v1, %v657_v3 }
 0x1d6   :  { %v934_v5 = vpop.f32.mrf.mxu0 }
 0x1d7   :  { %v665_v7 = vmax.f32 %v658_v4, 0.0 }
 0x1d8   :  { %v660_v8 = vpop.f32.mrf.mxu0 }
 0x1d9   :  { %v689_v9 = vmul.f32 %v834_v6, %v665_v7 }
 0x1da   :  { %v935_v10 = vpop.f32.mrf.mxu0 }
 0x1db   :  { %v697_v11 = vsel %vm690_vm2, %v689_v9, 0.0 }
 0x1dc   :  { %698 = vadd.xlane.f32.xlu1 %v697_v11 }
 0x1ed   :  { %703 = vperm.xlu1 %941, %v700_v12  }
 0x245   :  { %v693_v13 = vpop.xlane.xlu0 %692 }
 0x249   :  { %v696_v18 = vpop.xlane.xlu0 %695 }
 0x265   :  { %v699_v14 = vpop.xlane.xlu1 %698 }
 0x269   :  { %v704_v15 = vpop.permute.xlu1 %703 }
 0x26a   :  { %v708_v16 = vrot.slane %v704_v15, %v44_v34  ;;  %v712_v17 = vrot.slane %v704_v15, %v48_v30  ;;  %v716_v19 = vrot.slane %v704_v15, %v52_v37 }
 0x26c   :  { %v721_v20 = vadd.f32 %v712_v17, %v696_v18  ;;  %v720_v21 = vadd.f32 %v708_v16, %v693_v13  ;;  %v722_v22 = vadd.f32 %v716_v19, %v699_v14 }
 0x26e   :  { %730 = vperm.xlu1 %941, %v721_v20   ;;  %727 = vperm.xlu0 %942, %v720_v21  }
 0x272   :  { %733 = vperm.xlu1 %941, %v722_v22  }
 0x2e9   :  { %v731_v25 = vpop.permute.xlu1 %730  ;;  %v728_v26 = vpop.permute.xlu0 %727 }
 0x2ea   :  { %v744_v34 = vrot.slane %v731_v25, %v739_v24  ;;  %v740_v27 = vrot.slane %v728_v26, %v739_v24 }
 0x2ec   :  { %v750_v32 = vsel %vm749_vm3, %v744_v34, %v740_v27 }
 0x2ed   :  { %v734_v30 = vpop.permute.xlu1 %733 }
 0x2ee   :  { %v748_v31 = vrot.slane %v734_v30, %v739_v24 }
 0x2f0   :  { %v752_v37 = vsel %vm751_vm4, %v748_v31, %v750_v32 }
 0x2f1   :  { %754 = vxpose.xlu1.b32.start.end [1/1] (short) (narrow) %v752_v37, 8 }
 0x36d   :  { %v770_v33 = vpop.trf.xlu1 }
 0x36e   :  { %787 = vst.msk [vmem:[%s1221_s7] sm:$0xff] %vm786_vm5, %v770_v33 }

</bundles_post_ra>
